<compile_context>
chip_gen: v5e
topology: v5e:2x2
jax: 0.10.0
libtpu: 0.0.40
codegen_flags: <defaults>
</compile_context>

<pallas_src>
from typing import Any, Tuple

import numpy as np
import jax
import jax.numpy as jnp
from jax.experimental import pallas as pl
from jax.experimental.pallas import tpu as pltpu

_MIN_LANES = 128
_LANE_CANDIDATES = (2048, 1024, 512, 256, 128)   # widest lane-dense slab that divides numel
_MAX_INFLIGHT_DMAS = 4                           # 2-4 DMAs in flight saturates HBM


def _resolve_shape(numel: int, shape: Tuple[Any, ...]) -> Tuple[int, ...]:
    """Resolve a torch-style view shape (supports a single -1)."""
    shape = tuple(int(s) for s in shape)
    if shape.count(-1) > 1:
        raise ValueError("only one dimension can be inferred (-1)")
    if -1 in shape:
        known = 1
        for s in shape:
            if s != -1:
                known *= s
        if known == 0 or numel % known != 0:
            raise ValueError(f"shape {shape} invalid for input of size {numel}")
        shape = tuple(numel // known if s == -1 else s for s in shape)
    if int(np.prod(shape)) != numel:
        raise ValueError(f"shape {shape} invalid for input of size {numel}")
    return shape


def _make_dma_copy_kernel(chunks):
    """Build a kernel that copies an HBM slab to an HBM output via chunked DMAs.

    `chunks` is a static tuple of (row_offset, row_count); all DMAs are started first
    (up to _MAX_INFLIGHT_DMAS concurrently) and then waited on.
    """
    def kernel(x_hbm, o_hbm, sem):
        for c, (off, nrows) in enumerate(chunks):
            pltpu.make_async_copy(
                x_hbm.at[pl.ds(off, nrows)],
                o_hbm.at[pl.ds(off, nrows)],
                sem.at[c],
            ).start()
        for c, (off, nrows) in enumerate(chunks):
            pltpu.make_async_copy(
                x_hbm.at[pl.ds(off, nrows)],
                o_hbm.at[pl.ds(off, nrows)],
                sem.at[c],
            ).wait()
    return kernel


def _contiguous_copy(x: jax.Array) -> jax.Array:
    """Materialize a contiguous copy of x with chunked HBM->HBM DMAs.

    Requires numel % 128 == 0 (checked by the caller).  Returns a lane-dense
    (rows, lanes) slab holding x's elements in row-major order.
    """
    numel = int(np.prod(x.shape))
    lanes = next(l for l in _LANE_CANDIDATES if numel % l == 0)
    rows = numel // lanes
    slab = jnp.reshape(x, (rows, lanes))  # metadata-only reshape in the wrapper

    # Static, row-aligned, (nearly) even chunking so 2-4 DMA engines stream concurrently.
    n_chunks = max(1, min(_MAX_INFLIGHT_DMAS, rows))
    base, rem = divmod(rows, n_chunks)
    chunks, off = [], 0
    for c in range(n_chunks):
        sz = base + (1 if c < rem else 0)
        chunks.append((off, sz))
        off += sz
    chunks = tuple(chunks)

    itemsize = jnp.dtype(x.dtype).itemsize
    out = pl.pallas_call(
        _make_dma_copy_kernel(chunks),
        out_shape=jax.ShapeDtypeStruct((rows, lanes), x.dtype),
        # Raw HBM refs on both sides: no grid, no VMEM staging, no per-step overhead.
        in_specs=[pl.BlockSpec(memory_space=pl.ANY)],
        out_specs=pl.BlockSpec(memory_space=pl.ANY),
        scratch_shapes=[pltpu.SemaphoreType.DMA((n_chunks,))],
        cost_estimate=pl.CostEstimate(
            flops=0, transcendentals=0, bytes_accessed=2 * numel * itemsize),
    )(slab)
    return out


class View:
    """JAX/Pallas equivalent of the PyTorch View module.

    Default behaviour matches torch semantics via a zero-cost metadata reshape (JAX
    arrays are always contiguous).  Pass materialize=True to force a real HBM copy
    through the Pallas DMA kernel (e.g. as an explicit materialization boundary).
    """

    def __init__(self, *shape: Any, contiguous: bool = False, materialize: bool = False):
        self.contiguous = contiguous
        self.params = shape
        self._materialize = materialize

    def __call__(self, x: jax.Array) -> jax.Array:
        numel = int(np.prod(x.shape))
        target = _resolve_shape(numel, self.params)

        run_copy = (
            self._materialize
            and self.contiguous
            and numel > 0
            and numel % _MIN_LANES == 0
        )
        if not run_copy:
            # Pure view (or unaligned input): zero-cost metadata reshape.
            return jnp.reshape(x, target)

        return jnp.reshape(_contiguous_copy(x), target)


if __name__ == "__main__":
    key = jax.random.PRNGKey(0)
    # Small input consistent with an NCHW-style activation: (2, 4, 16, 16).
    x = jax.random.normal(key, (2, 4, 16, 16), dtype=jnp.float32)
    ref = np.asarray(x).reshape(2, 4, -1)

    # 1) Default path: pure view -> zero-cost jnp.reshape (no kernel launch).
    view_fast = View(2, 4, -1, contiguous=True)
    y_fast = jax.block_until_ready(view_fast(x))
    assert y_fast.shape == (2, 4, 256), y_fast.shape
    assert y_fast.dtype == x.dtype
    np.testing.assert_array_equal(np.asarray(y_fast), ref)

    # 2) Kernel path: explicit materialized copy via HBM->HBM DMA (single chunk here).
    view_kernel = View(2, 4, -1, contiguous=True, materialize=True)
    y_kernel = jax.block_until_ready(view_kernel(x))
    assert y_kernel.shape == (2, 4, 256), y_kernel.shape
    assert y_kernel.dtype == x.dtype
    np.testing.assert_array_equal(np.asarray(y_kernel), ref)

    # 3) Larger bf16 input to exercise the multi-chunk (4 concurrent DMAs) path and
    #    confirm dtype-independent correctness.
    x2 = jax.random.normal(jax.random.PRNGKey(0), (4, 8, 64, 128), dtype=jnp.bfloat16)
    ref2 = np.asarray(x2).reshape(4, 8, -1)
    view2 = View(4, 8, -1, contiguous=True, materialize=True)
    y2 = jax.block_until_ready(view2(x2))
    assert y2.shape == (4, 8, 64 * 128), y2.shape
    assert y2.dtype == x2.dtype
    np.testing.assert_array_equal(np.asarray(y2), ref2)

    print("KERNEL_OK")
</pallas_src>

<mosaic_0001>
module attributes {stable_mosaic.version = 11 : i64} {
  func.func @kernel(%arg0: memref<1x2048xf32, #tpu.memory_space<any>>, %arg1: memref<1x2048xf32, #tpu.memory_space<any>>, %arg2: memref<1x!tpu.dma_semaphore, #tpu.memory_space<semaphore_mem>>) attributes {dimension_semantics = [], scalar_prefetch = 0 : i64, scratch_operands = 1 : i64, tpu.core_type = #tpu.core_type<tc>} {
    %c0_i32 = arith.constant 0 : i32
    %c0_i32_0 = arith.constant 0 : i32
    %c0_i32_1 = arith.constant 0 : i32
    %0 = tpu.memref_slice %arg0[%c0_i32_0, %c0_i32_1] : memref<1x2048xf32, #tpu.memory_space<any>> -> memref<1x2048xf32, #tpu.memory_space<any>>
    %c0_i32_2 = arith.constant 0 : i32
    %c0_i32_3 = arith.constant 0 : i32
    %1 = tpu.memref_slice %arg1[%c0_i32_2, %c0_i32_3] : memref<1x2048xf32, #tpu.memory_space<any>> -> memref<1x2048xf32, #tpu.memory_space<any>>
    %2 = tpu.memref_slice %arg2[%c0_i32] : memref<1x!tpu.dma_semaphore, #tpu.memory_space<semaphore_mem>> -> memref<1x!tpu.dma_semaphore, #tpu.memory_space<semaphore_mem>>
    %3 = tpu.memref_squeeze %2 : memref<1x!tpu.dma_semaphore, #tpu.memory_space<semaphore_mem>> -> memref<!tpu.dma_semaphore, #tpu.memory_space<semaphore_mem>>
    tpu.enqueue_dma source(%0 : memref<1x2048xf32, #tpu.memory_space<any>>) target(%1 : memref<1x2048xf32, #tpu.memory_space<any>>) target_semaphore(%3 : memref<!tpu.dma_semaphore, #tpu.memory_space<semaphore_mem>>)
    %c0_i32_4 = arith.constant 0 : i32
    %c0_i32_5 = arith.constant 0 : i32
    %c0_i32_6 = arith.constant 0 : i32
    %4 = tpu.memref_slice %arg0[%c0_i32_5, %c0_i32_6] : memref<1x2048xf32, #tpu.memory_space<any>> -> memref<1x2048xf32, #tpu.memory_space<any>>
    %c0_i32_7 = arith.constant 0 : i32
    %c0_i32_8 = arith.constant 0 : i32
    %5 = tpu.memref_slice %arg1[%c0_i32_7, %c0_i32_8] : memref<1x2048xf32, #tpu.memory_space<any>> -> memref<1x2048xf32, #tpu.memory_space<any>>
    %6 = tpu.memref_slice %arg2[%c0_i32_4] : memref<1x!tpu.dma_semaphore, #tpu.memory_space<semaphore_mem>> -> memref<1x!tpu.dma_semaphore, #tpu.memory_space<semaphore_mem>>
    %7 = tpu.memref_squeeze %6 : memref<1x!tpu.dma_semaphore, #tpu.memory_space<semaphore_mem>> -> memref<!tpu.dma_semaphore, #tpu.memory_space<semaphore_mem>>
    tpu.wait_dma2 semaphore(%7 : memref<!tpu.dma_semaphore, #tpu.memory_space<semaphore_mem>>) src(%4 : memref<1x2048xf32, #tpu.memory_space<any>>) dst(%5 : memref<1x2048xf32, #tpu.memory_space<any>>)
    return
  }
}

</mosaic_0001>

<bundles_post_ra>
// kernel: tpu_custom_call.1
= control target key start
LH: loop header
LB: loop body
LE: loop exit
PB: predicated region body
PF: predicated region fallthrough
CT: control target
= control target key end

     0   :  { %s32_s12 = smov [#allocation2]   ;;  %s33_s13 = smov [#allocation3]   ;;  %s51_s0 = inlined_call_operand.hbm [shape: f32[1,2048], index: 0, kind: input, shape index: {}]   ;;  %s52_s1 = inlined_call_operand.hbm [shape: f32[1,2048], index: 1, kind: output, shape index: {}]  }
   0x1   :  { %s10_s8 = sshll.u32 %s51_s0, 4  ;;  %s12_s11 = sshll.u32 %s52_s1, 4  ;;  %s11_s8 = int_to_ptr.hbm [resolvable:$true] %s10_s8  ;;  %s13_s11 = int_to_ptr.hbm [resolvable:$true] %s12_s11 }
   0x2   :  { %s34_s14 = smov 0  }
   0x3   :  { %16 = dma.general %s11_s8, 256, %s13_s11, %s32_s12, %s33_s13, [#allocation4], %s34_s14, 0  }
   0x4   :  { %30 = dma.done.wait [#allocation2], 256 }
   0x5   :  { %31 = vsyncadd [#allocation2], 4294967040 }
   0x6   :  { %20 = vsyncmov [#allocation2] }
   0x9   :  { %s21_s15 = vpop.sfrf %20 }
   0xa   :  { %p26_p0 = scmp.ne.s32.totalorder %s21_s15, 0 }
   0xc   :  { %25 = shalt.err (%p26_p0)  }

</bundles_post_ra>
